<compile_context>
chip_gen: v6e
topology: v6e:2x2x1
jax: 0.10.0
libtpu: 0.0.40
codegen_flags: <defaults>
</compile_context>

<pallas_src>
import functools

import jax
import jax.numpy as jnp
from jax.experimental import pallas as pl
from jax.experimental.pallas import tpu as pltpu

VAR_EPS = 1e-3  # matches the PyTorch module


def _context_norm_kernel(x_ref, o_ref, *, inv_nm1):
    x = x_ref[...].astype(jnp.float32)                             # [Bb, Cb, N]
    mu = jnp.mean(x, axis=-1, keepdims=True)                       # per-(b, c) mean
    # Unbiased variance (torch.var default).  The centered tensor is recomputed
    # in the output expression instead of being kept live as a named temp.
    var = jnp.sum((x - mu) * (x - mu), axis=-1, keepdims=True) * inv_nm1
    o_ref[...] = ((x - mu) * jax.lax.rsqrt(var + VAR_EPS)).astype(o_ref.dtype)


def _pick_blocks(B, C, N, itemsize):
    """Choose (bb, cb) for blocks of shape (bb, cb, N).

    Priorities (in order):
      1. Legality: bb | B, cb | C, and cb is either C itself or a multiple of
         the sublane tile (8 for 4-byte dtypes, 16 for 2-byte) -- (8, 128) rule.
      2. Block f32 footprint <= ~4 MiB, so the ~6x VMEM cost (in + out
         double-buffered + temps) stays well under v7x's 64 MiB physical VMEM.
      3. At least 2 grid steps overall whenever the shape allows it, so both
         v7x TensorCores are fed (costs one extra ~0.35 us step on 1-TC chips).
      4. Largest block satisfying the above (amortizes per-step overhead);
         if nothing fits the budget, the smallest legal block.
    """
    TARGET_BLOCK_F32 = 4 << 20
    sub = 8 if itemsize >= 4 else 16
    row_f32 = N * 4

    b_cands = [d for d in range(1, B + 1) if B % d == 0]
    c_cands = [d for d in range(1, C + 1) if C % d == 0 and (d == C or d % sub == 0)]

    def score(bc):
        bb, cb = bc
        blk = bb * cb * row_f32
        fits = blk <= TARGET_BLOCK_F32
        multi = (B // bb) * (C // cb) >= 2
        return (fits, multi, blk if fits else -blk)

    return max(((b, c) for b in b_cands for c in c_cands), key=score)


@jax.jit
def context_normalization_pallas(x):
    B, C, N = x.shape
    bb, cb = _pick_blocks(B, C, N, jnp.dtype(x.dtype).itemsize)
    kernel = functools.partial(
        _context_norm_kernel, inv_nm1=1.0 / float(max(N - 1, 1)))
    return pl.pallas_call(
        kernel,
        out_shape=jax.ShapeDtypeStruct((B, C, N), x.dtype),
        grid=(B // bb, C // cb),
        in_specs=[pl.BlockSpec((bb, cb, N), lambda b, c: (b, c, 0))],
        out_specs=pl.BlockSpec((bb, cb, N), lambda b, c: (b, c, 0)),
        compiler_params=pltpu.CompilerParams(
            dimension_semantics=("parallel", "parallel"),
            vmem_limit_bytes=48 * 1024 * 1024),
    )(x)


def context_normalization_reference(x):
    """Pure-JAX reference mirroring the PyTorch forward."""
    mu = jnp.mean(x, axis=2, keepdims=True)
    var = jnp.var(x, axis=2, keepdims=True, ddof=1)   # torch.var: unbiased
    return (x - mu) / jnp.sqrt(var + VAR_EPS)


if __name__ == "__main__":
    B, C, N = 4, 8, 256   # small, lane-dense (N is a multiple of 128)
    x = jax.random.normal(jax.random.PRNGKey(0), (B, C, N), jnp.float32)

    out = jax.block_until_ready(context_normalization_pallas(x))
    ref = context_normalization_reference(x)

    assert out.shape == (B, C, N)
    assert jnp.allclose(out, ref, rtol=1e-4, atol=1e-4), (
        f"max abs err {jnp.max(jnp.abs(out - ref))}")
    print("KERNEL_OK")
</pallas_src>

<mosaic_0001>
module attributes {stable_mosaic.version = 11 : i64} {
  func.func @_context_norm_kernel(%arg0: i32, %arg1: i32, %arg2: memref<2x8x256xf32, #tpu.memory_space<vmem>>, %arg3: memref<2x8x256xf32, #tpu.memory_space<vmem>>) attributes {dimension_semantics = [#tpu.dimension_semantics<parallel>, #tpu.dimension_semantics<parallel>], iteration_bounds = array<i64: 2, 1>, scalar_prefetch = 0 : i64, scratch_operands = 0 : i64, tpu.core_type = #tpu.core_type<tc>, window_params = [{transform_indices = @transform_0, window_bounds = array<i64: 2, 8, 256>}, {transform_indices = @transform_1, window_bounds = array<i64: 2, 8, 256>}]} {
    %c0 = arith.constant 0 : index
    %c0_0 = arith.constant 0 : index
    %c0_1 = arith.constant 0 : index
    %0 = vector.load %arg2[%c0, %c0_0, %c0_1] : memref<2x8x256xf32, #tpu.memory_space<vmem>>, vector<2x8x256xf32>
    %cst = arith.constant dense<0.000000e+00> : vector<2x8xf32>
    %1 = vector.multi_reduction <add>, %0, %cst [2] : vector<2x8x256xf32> to vector<2x8xf32>
    %2 = vector.shape_cast %1 : vector<2x8xf32> to vector<2x8x1xf32>
    %cst_2 = arith.constant 2.560000e+02 : f32
    %3 = vector.broadcast %cst_2 : f32 to vector<2x8x1xf32>
    %4 = arith.divf %2, %3 : vector<2x8x1xf32>
    %5 = vector.broadcast %4 : vector<2x8x1xf32> to vector<2x8x256xf32>
    %6 = arith.subf %0, %5 : vector<2x8x256xf32>
    %7 = vector.broadcast %4 : vector<2x8x1xf32> to vector<2x8x256xf32>
    %8 = arith.subf %0, %7 : vector<2x8x256xf32>
    %9 = arith.mulf %6, %8 : vector<2x8x256xf32>
    %cst_3 = arith.constant dense<0.000000e+00> : vector<2x8xf32>
    %10 = vector.multi_reduction <add>, %9, %cst_3 [2] : vector<2x8x256xf32> to vector<2x8xf32>
    %11 = vector.shape_cast %10 : vector<2x8xf32> to vector<2x8x1xf32>
    %cst_4 = arith.constant 0.00392156886 : f32
    %12 = vector.broadcast %cst_4 : f32 to vector<2x8x1xf32>
    %13 = arith.mulf %11, %12 : vector<2x8x1xf32>
    %14 = vector.broadcast %4 : vector<2x8x1xf32> to vector<2x8x256xf32>
    %15 = arith.subf %0, %14 : vector<2x8x256xf32>
    %cst_5 = arith.constant 1.000000e-03 : f32
    %16 = vector.broadcast %cst_5 : f32 to vector<2x8x1xf32>
    %17 = arith.addf %13, %16 : vector<2x8x1xf32>
    %18 = math.rsqrt %17 : vector<2x8x1xf32>
    %19 = vector.broadcast %18 : vector<2x8x1xf32> to vector<2x8x256xf32>
    %20 = arith.mulf %15, %19 : vector<2x8x256xf32>
    %c0_6 = arith.constant 0 : index
    %c0_7 = arith.constant 0 : index
    %c0_8 = arith.constant 0 : index
    %21 = vector.load %arg3[%c0_6, %c0_7, %c0_8] : memref<2x8x256xf32, #tpu.memory_space<vmem>>, vector<2x8x256xf32>
    tpu.vector_store %arg3[%c0_6, %c0_7, %c0_8], %20 {strides = array<i32>} : memref<2x8x256xf32, #tpu.memory_space<vmem>>, vector<2x8x256xf32>,
    return
  }
  func.func @transform_0(%arg0: i32, %arg1: i32) -> (i32, i32, i32) {
    %c0_i32 = arith.constant 0 : i32
    %c0_i32_0 = arith.constant 0 : i32
    return %arg0, %arg1, %c0_i32 : i32, i32, i32
  }
  func.func @transform_1(%arg0: i32, %arg1: i32) -> (i32, i32, i32) {
    %c0_i32 = arith.constant 0 : i32
    %c0_i32_0 = arith.constant 0 : i32
    return %arg0, %arg1, %c0_i32 : i32, i32, i32
  }
}

</mosaic_0001>

<bundles_post_ra>
// kernel: context_normalization_pallas.1
= control target key start
LH: loop header
LB: loop body
LE: loop exit
PB: predicated region body
PF: predicated region fallthrough
CT: control target
= control target key end

     0   :  { %6 = vsyncpa [#allocation3], 0  ;;  %s668_s0 = inlined_call_operand.hbm [shape: f32[4,8,256], index: 0, kind: input, shape index: {}]   ;;  %s669_s1 = inlined_call_operand.hbm [shape: f32[4,8,256], index: 1, kind: output, shape index: {}]  }
   0x1   :  { %8 = vsyncpa [#allocation3 + $0x1], 0 }
   0x2   :  { %9 = vsyncpa [#allocation4], 0 }
   0x3   :  { %11 = vsyncpa [#allocation4 + $0x1], 0  ;;  %s518_s6 = smov 0   ;;  %s520_s7 = smov 0  }
   0x4   :  { %s522_s8 = smov 0   ;;  %s524_s9 = smov 0  }
   0x5   :  { %s526_s10 = smov 0   ;;  %s528_s11 = smov 0  }
   0x6 LB: > { %s301_s12 = sadd.s32 4294967295, %s500_s11   ;;  %s302_s13 = sadd.s32 4294967294, %s500_s11   ;;  %s500_s11 = sphi %s528_s11, %s17_s11   ;;  %s496_s10 = sphi %s526_s10, %s680_s10   ;;  %s492_s9 = sphi %s524_s9, %s679_s9   ;;  %s488_s8 = sphi %s522_s8, %s678_s8   ;;  %s484_s7 = sphi %s520_s7, %s677_s7   ;;  %s480_s6 = sphi %s518_s6, %s676_s6  }
   0x7   : > { %s29_s14 = sadd.s32 1, %s496_s10  ;;  %s38_s15 = sadd.s32 1, %s488_s8 }
   0x8   : > { %p31_p0 = scmp.ge.s32.totalorder %s29_s14, 2  ;;  %p45_p1 = scmp.ne.s32.totalorder %s488_s8, %s484_s7 }
   0x9   : > { %p46_p2 = scmp.eq.s32.totalorder %s500_s11, 0  ;;  %p51_p3 = scmp.ne.s32.totalorder %s484_s7, %s480_s6 }
   0xa   : > { %s682_s14 = smov (%p31_p0, %s29_s14), 0  ;;  %p52_p5 = scmp.eq.s32.totalorder %s301_s12, 0 }
   0xb   : > { %p559_p4 = por %p46_p2, %p45_p1  ;;  %s33_s17 = ssub.s32 %s496_s10, %s682_s14 }
   0xc   : > { %p77_p6 = scmp.eq.s32.totalorder %s301_s12, 1  ;;  %p36_p7 = scmp.eq.s32.totalorder %s33_s17, 0 }
   0xd   : > { %p565_p8 = por %p52_p5, %p51_p3  ;;  %p83_p10 = scmp.eq.s32.totalorder %s302_s13, 1 }
   0xe   : > { %p569_p9 = por %p77_p6, %p45_p1  ;;  %p334_p13 = scmp.lt.s32.totalorder %s500_s11, 2 }
   0xf   : > { %s574_s20 = scalar_select %p36_p7, %s488_s8, %s38_s15  }
  0x10   : > { %p576_p11 = por %p83_p10, %p51_p3  ;;  %s103_s22 = sand.u32 1, %s488_s8  }
  0x11   : > { %s305_s23 = sshll.u32 %s103_s22, 5  ;;  %s319_s24 = sshll.u32 %s496_s10, 9 }
  0x12   : > { %s116_s27 = scalar_lea.hbm %s668_s0, %s319_s24  ;;  %s107_s28 = scalar_lea.vmem [#allocation2], %s305_s23 }
  0x13   : > { %s117_s29 = sshll.u32 %s107_s28, 4  ;;  %p589_p0 = pnand %p334_p13, %p559_p4  ;;  %s118_s29 = int_to_ptr.vmem [resolvable:$true] %s117_s29 }
  0x14   : > { %p309_p1 = scmp.ge.s32.totalorder %s500_s11, 1  ;;  %s104_s2 = scalar_lea.sflag [#allocation3], %s103_s22 }
  0x15   : > { %p394_p2 = pneg %p589_p0  ;;  %s405_s3 = scalar_lea.vmem %s118_s29, 512 }
  0x16   : > { %p406_p3 = scmp.ne.s32.totalorder %s118_s29, %s405_s3  ;;  %s502_s4 = smov [#allocation2]  }
  0x17   : > { %s410_s5 = sshll.u32 %s502_s4, 4  ;;  %s411_s5 = int_to_ptr.vmem [resolvable:$false] %s410_s5 }
  0x18   : > { %p408_p5 = pnand %p406_p3, %p394_p2  ;;  %s412_s12 = scalar_lea.vmem %s411_s5, 1024 }
  0x19   : > { %p413_p7 = scmp.lt.s32.totalorder %s118_s29, %s411_s5  ;;  %p414_p10 = scmp.lt.s32.totalorder %s412_s12, %s405_s3 }
  0x1a   : > { %p409_p6 = pneg %p408_p5 }
  0x1b   : > { %p415_p12 = por %p414_p10, %p413_p7 }
  0x1d   : > { %p416_p4 = pnand %p415_p12, %p409_p6 }
  0x1f   : > { %419 = shalt.err (!%p416_p4)
}
  0x20   : > { %s503_s13 = smov 256   ;;  %s504_s15 = smov 16  }
  0x21   : > { %329 = dma.hbm_to_vmem [thread:$0]  (!%p589_p0), %s116_s27, 512, %s118_s29, %s104_s2, %s503_s13, %s503_s13, %s504_s15  }
  0x22   : > { %p125_p13 = scmp.lt.s32.totalorder %s500_s11, 3 }
  0x24   : > { %p126_p2 = pnand %p309_p1, %p125_p13 }
  0x25   : > { %s602_s16 = sand.u32 (!%p126_p2), 1, %s484_s7  }
  0x26   : > { %129 = sbr.rel (%p126_p2) target bundleno = 369 (0x171), region = 24  ;;  %s310_s17 = sshll.u32 (!%p126_p2), %s602_s16, 5 }
  0x27   : > { %s132_s22 = scalar_lea.sflag (!%p126_p2), [#allocation3], %s602_s16  ;;  %s135_s23 = scalar_lea.vmem (!%p126_p2), [#allocation2], %s310_s17 }
  0x2b   : > { %471 = dma.done.wait (%p565_p8), %s132_s22, 512  }
  0x2c   : > { %473 = vsyncadd (%p565_p8), %s132_s22, 4294966784  ;;  %v156_v0 = vld [vmem:[%s135_s23] sm:$0xff]  ;;  %v157_v1 = vld [vmem:[%s135_s23 + $0x8] sm:$0xff]  ;;  %s321_s18 = sshll.u32 %s492_s9, 9  ;;  %s153_s24 = scalar_lea.vmem [#allocation5], %s310_s17 }
  0x2d   : > { %v158_v2 = vld [vmem:[%s135_s23 + $0x10] sm:$0xff]  ;;  %v160_v3 = vadd.f32 %v157_v1, %v156_v0  ;;  %v159_v4 = vld [vmem:[%s135_s23 + $0x18] sm:$0xff]  ;;  %s214_s25 = sshll.u32 %s153_s24, 4  ;;  %s618_s28 = scalar_lea.hbm %s669_s1, %s321_s18  ;;  %s620_s25 = int_to_ptr.vmem [resolvable:$true] %s214_s25 }
  0x2e   : > { %v163_v5 = vadd.f32 %v159_v4, %v158_v2  ;;  %s198_s9 = scalar_lea.sflag [#allocation4], %s602_s16  ;;  %s420_s29 = scalar_lea.vmem %s620_s25, 512 }
  0x2f   : > { %161 = vadd.xlane.f32.xlu0 %v160_v3  ;;  %p421_p8 = scmp.ne.s32.totalorder %s620_s25, %s420_s29  ;;  %s505_s30 = smov [#allocation5]  }
  0x30   : > { %s424_s2 = sshll.u32 %s505_s30, 4  ;;  %s425_s2 = int_to_ptr.vmem [resolvable:$false] %s424_s2 }
  0x31   : > { %p422_p12 = pnand %p421_p8, %p569_p9  ;;  %s426_s3 = scalar_lea.vmem %s425_s2, 1024 }
  0x32   : > { %p427_p1 = scmp.lt.s32.totalorder %s620_s25, %s425_s2  ;;  %p428_p3 = scmp.lt.s32.totalorder %s426_s3, %s420_s29 }
  0x33   : > { %164 = vadd.xlane.f32.xlu0 %v163_v5  ;;  %p423_p0 = pneg %p422_p12 }
  0x34   : > { %p429_p5 = por %p428_p3, %p427_p1 }
  0x36   : > { %p430_p6 = pnand %p429_p5, %p423_p0 }
  0xb8   : > { %v162_v6 = vpop.xlane.xlu0 %161 }
  0xb9   : > { %v167_v7 = vmul.f32 0.00390625, %v162_v6 }
  0xbb   : > { %v169_v8 = vsub.f32 %v156_v0, %v167_v7  ;;  %v170_v9 = vsub.f32 %v157_v1, %v167_v7 }
  0xbc   : > { %v165_v10 = vpop.xlane.xlu0 %164 }
  0xbd   : > { %v168_v11 = vmul.f32 0.00390625, %v165_v10  ;;  %v173_v12 = vmul.f32 %v169_v8, %v169_v8  ;;  %v174_v13 = vmul.f32 %v170_v9, %v170_v9 }
  0xbf   : > { %v171_v14 = vsub.f32 %v158_v2, %v168_v11  ;;  %v172_v15 = vsub.f32 %v159_v4, %v168_v11  ;;  %v177_v16 = vadd.f32 %v174_v13, %v173_v12 }
  0xc1   : > { %178 = vadd.xlane.f32.xlu1 %v177_v16  ;;  %v175_v17 = vmul.f32 %v171_v14, %v171_v14  ;;  %v176_v18 = vmul.f32 %v172_v15, %v172_v15 }
  0xc3   : > { %v180_v19 = vadd.f32 %v176_v18, %v175_v17 }
  0xc5   : > { %181 = vadd.xlane.f32.xlu1 %v180_v19 }
 0x14a   : > { %v179_v20 = vpop.xlane.xlu1 %178 }
 0x14b   : > { %v183_v21 = vmul.f32 0.003921569, %v179_v20 }
 0x14d   : > { %v185_v22 = vadd.f32 0.001, %v183_v21 }
 0x14e   : > { %v182_v23 = vpop.xlane.xlu1 %181 }
 0x14f   : > { %388 = vrsqrt.f32 %v185_v22  ;;  %v184_v24 = vmul.f32 0.003921569, %v182_v23 }
 0x151   : > { %v186_v25 = vadd.f32 0.001, %v184_v24 }
 0x153   : > { %390 = vrsqrt.f32 %v186_v25 }
 0x15c   : > { %v389_v26 = vpop.eup %388 }
 0x15d   : > { %v189_v27 = vmul.f32 %v389_v26, %v169_v8  ;;  %v190_v28 = vmul.f32 %v389_v26, %v170_v9 }
 0x15f   : > { %193 = vst [vmem:[%s153_s24] sm:$0xff] %v189_v27  ;;  %194 = vst [vmem:[%s153_s24 + $0x8] sm:$0xff] %v190_v28 }
 0x160   : > { %v391_v29 = vpop.eup %390 }
 0x161   : > { %v191_v30 = vmul.f32 %v391_v29, %v171_v14  ;;  %v192_v31 = vmul.f32 %v391_v29, %v172_v15 }
 0x163   : > { %195 = vst [vmem:[%s153_s24 + $0x10] sm:$0xff] %v191_v30  ;;  %196 = vst [vmem:[%s153_s24 + $0x18] sm:$0xff] %v192_v31 }
 0x164   : > { %433 = shalt.err (!%p430_p6)
}
 0x165   : > { %s434_s4 = scalar_lea.hbm %s618_s28, 512  ;;  %s438_s13 = scalar_lea.hbm %s669_s1, 1024 }
 0x166   : > { %p435_p7 = scmp.ne.s32.totalorder %s618_s28, %s434_s4  ;;  %p439_p13 = scmp.lt.s32.totalorder %s618_s28, %s669_s1 }
 0x167   : > { %p440_p2 = scmp.lt.s32.totalorder %s438_s13, %s434_s4 }
 0x168   : > { %p436_p10 = pnand %p435_p7, %p569_p9 }
 0x169   : > { %p441_p8 = por %p440_p2, %p439_p13 }
 0x16a   : > { %p437_p4 = pneg %p436_p10 }
 0x16c   : > { %p442_p12 = pnand %p441_p8, %p437_p4 }
 0x16e   : > { %445 = shalt.err (!%p442_p12)
}
 0x16f   : > { %s506_s22 = smov 256   ;;  %s507_s23 = smov 16  }
 0x170   : > { %324 = dma.vmem_to_hbm [thread:$0]  (%p569_p9), %s620_s25, 512, %s618_s28, %s198_s9, %s506_s22, %s506_s22, %s507_s23  }
 0x171 PF: > { %s229_s18 = sand.u32 1, %s480_s6   ;;  %p675_p0 = scmp.ge.s32.totalorder %s500_s11, 2 }
 0x172   : > { %s230_s24 = scalar_lea.sflag [#allocation4], %s229_s18 }
 0x173   : > { %p331_p1 = pnand %p675_p0, %p576_p11 }
 0x175   : > { %p332_p3 = pneg %p331_p1 }
 0x177   : > { %475 = dma.done.wait (%p332_p3), %s230_s24, 512  }
 0x178   : > { %477 = vsyncadd (%p332_p3), %s230_s24, 4294966784  ;;  %s17_s11 = sadd.s32 1, %s500_s11   ;;  %s676_s6 = smov %s484_s7 }
 0x179   : > { %p14_p5 = scmp.ge.s32.totalorder %s17_s11, 4   ;;  %s677_s7 = smov %s488_s8 }
 0x17a   : > { %s678_s8 = smov %s574_s20  ;;  %s679_s9 = smov %s496_s10 }
 0x17b   : > { %s680_s10 = smov %s682_s14  ;;  %16 = sbr.rel (!%p14_p5) target bundleno = 6 (0x6), region = 69 }
 0x180   :  { %235 = vsyncpa [#allocation3], 1 }
 0x181   :  { %237 = vsyncpa [#allocation3 + $0x1], 1 }
 0x182   :  { %238 = vsyncpa [#allocation4], 1 }
 0x183   :  { %240 = vsyncpa [#allocation4 + $0x1], 1 }

</bundles_post_ra>
